<compile_context>
chip_gen: v6e
topology: v6e:2x2x1
jax: 0.10.0
libtpu: 0.0.40
codegen_flags: <defaults>
</compile_context>

<pallas_src>
import functools

import jax
import jax.numpy as jnp
from jax.experimental import pallas as pl
from jax.experimental.pallas import tpu as pltpu


def _sublane_multiple(itemsize):
    # f32 -> 8, bf16 -> 16, int8/fp8 -> 32 (sub-32-bit dtypes pack sublanes).
    return max(8, 32 // max(1, int(itemsize)))


def _vmem_capacity_bytes():
    """Physical VMEM per TensorCore; conservative fallback if the query fails."""
    try:
        cap = int(pltpu.get_tpu_info().vmem_capacity_bytes)
    except Exception:
        cap = 64 * 1024 * 1024  # v7x-sized fallback: safe on every generation
    return min(max(cap, 32 * 1024 * 1024), 256 * 1024 * 1024)


def _default_target_tile_bytes():
    # 2 inputs x 2 pipeline buffers -> keep the pipeline around VMEM/2:
    #   v7x  (64 MiB VMEM)  ->  8 MiB / input tile (32 MiB pipeline)
    #   v5e/v6e (128 MiB)   -> 16 MiB / input tile (64 MiB pipeline)
    cap = _vmem_capacity_bytes()
    return int(min(16 * 1024 * 1024, max(2 * 1024 * 1024, cap // 8)))


def _choose_tile_rows(rows, n_lanes, itemsize, target_tile_bytes):
    sub = _sublane_multiple(itemsize)
    bytes_per_row = n_lanes * itemsize        # n_lanes is a 128-multiple -> layout exact
    tb = (target_tile_bytes // bytes_per_row) // sub * sub
    tb = max(sub, tb)
    if tb >= rows:
        return int(rows)                      # single full-extent block
    return int(tb)


def _triplet_hinge_sum_kernel(margin_ref, ap_ref, an_ref, out_ref, *, tb, total_rows):
    """One row-tile: partial = sum(relu(ap - an + margin)) over valid rows."""
    ap = ap_ref[...]
    an = an_ref[...]
    # Hinge in the native input dtype (bf16 stays packed on v6e/v7x VALUs).
    m = margin_ref[0].astype(ap.dtype)
    hinge = jnp.maximum(ap - an + m, 0.0)
    # f32 accumulation: per-row sums, then the block partial.
    row_sums = jnp.sum(hinge.astype(jnp.float32), axis=-1, keepdims=True)  # (tb, 1)
    # Ragged last tile: mask at per-row granularity (tb ops, not tb*N).  This
    # is compiled out entirely when the tile evenly divides the row count.
    if total_rows % tb != 0:
        row0 = pl.program_id(0) * tb
        rid = row0 + jax.lax.broadcasted_iota(jnp.int32, row_sums.shape, 0)
        row_sums = jnp.where(rid < total_rows, row_sums, 0.0)
    partial = jnp.sum(row_sums)
    # Lane-dense, unmasked (8,128) store of the per-block partial sum.
    out_ref[...] = jnp.full(out_ref.shape, partial, dtype=jnp.float32)


def _hinge_sum_pallas(ap2, an2, margin, tile_rows):
    """sum(relu(ap2 - an2 + margin)) over a lane-dense (rows, n) slab, in f32."""
    rows, n = ap2.shape
    itemsize = ap2.dtype.itemsize
    if tile_rows is None:
        tb = _choose_tile_rows(rows, n, itemsize, _default_target_tile_bytes())
    else:
        sub = _sublane_multiple(itemsize)
        tb = min(int(rows), max(sub, int(tile_rows) // sub * sub))
    num_blocks = pl.cdiv(rows, tb)

    # Layout-exact VMEM budget for the pipeline + explicit scoped limit.
    tile_bytes = tb * n * itemsize
    pipeline_bytes = 2 * 2 * tile_bytes       # 2 inputs x 2 pipeline buffers
    cap = _vmem_capacity_bytes()
    vmem_limit = int(min(cap - 4 * 1024 * 1024, pipeline_bytes + 8 * 1024 * 1024))
    vmem_limit = max(vmem_limit, 16 * 1024 * 1024)

    kernel = functools.partial(_triplet_hinge_sum_kernel, tb=tb, total_rows=rows)
    partials = pl.pallas_call(
        kernel,
        out_shape=jax.ShapeDtypeStruct((num_blocks, 8, 128), jnp.float32),
        grid_spec=pltpu.PrefetchScalarGridSpec(
            num_scalar_prefetch=1,            # margin lives in SMEM
            grid=(num_blocks,),
            in_specs=[
                pl.BlockSpec((tb, n), lambda i, m: (i, 0)),
                pl.BlockSpec((tb, n), lambda i, m: (i, 0)),
            ],
            out_specs=pl.BlockSpec((1, 8, 128), lambda i, m: (i, 0, 0)),
        ),
        compiler_params=pltpu.CompilerParams(
            dimension_semantics=("parallel",),  # independent blocks -> v7x 2-TC shard
            vmem_limit_bytes=vmem_limit,
        ),
    )(jnp.asarray([margin], dtype=jnp.float32), ap2, an2)

    # Dense epilogue: each block wrote 1024 copies of its partial; sum the whole
    # slab densely and rescale (no strided one-f32-per-4KiB gather).
    return jnp.sum(partials) * (1.0 / 1024.0)


def triplet_margin_loss(ap_distance, an_distance, margin, *, tile_rows=None):
    """relu(ap_distance - an_distance + margin).mean() via a tiled Pallas reduction."""
    assert ap_distance.shape == an_distance.shape
    ap_flat = ap_distance.reshape(-1)
    an_flat = an_distance.reshape(-1)
    count = ap_flat.shape[0]

    # Re-tile to a lane-dense 2-D slab with a 128-multiple last dim so vregs,
    # DMAs and VMEM tiles are fully utilized (also for 1-D distance vectors).
    n = 128
    for cand in (512, 256, 128):
        if count % cand == 0:
            n = cand
            break
    main = (count // n) * n
    tail = count - main

    total = jnp.float32(0.0)
    if main > 0:
        body_ap = ap_flat if tail == 0 else ap_flat[:main]
        body_an = an_flat if tail == 0 else an_flat[:main]
        total = total + _hinge_sum_pallas(
            body_ap.reshape(main // n, n),
            body_an.reshape(main // n, n),
            margin, tile_rows)
    if tail > 0:
        # Sub-vreg remainder (< 128 elements): plain JAX, negligible cost.
        apt = ap_flat[main:].astype(jnp.float32)
        ant = an_flat[main:].astype(jnp.float32)
        total = total + jnp.sum(jnp.maximum(apt - ant + jnp.float32(margin), 0.0))
    return total / jnp.float32(count)


if __name__ == "__main__":
    margin = 1.0  # module __init__ parameter, chosen deterministically

    key = jax.random.PRNGKey(0)
    k1, k2, k3, k4 = jax.random.split(key, 4)

    # Case 1: typical TripletMarginLoss input -- 1-D per-sample distances.
    # batch=1000 exercises the lane-dense re-tiling ((7,128) kernel slab) plus
    # the 104-element plain-JAX tail.
    batch = 1000
    ap1 = jax.random.uniform(k1, (batch,), dtype=jnp.float32) * 2.0
    an1 = jax.random.uniform(k2, (batch,), dtype=jnp.float32) * 2.0
    loss1 = triplet_margin_loss(ap1, an1, margin)
    jax.block_until_ready(loss1)
    ref1 = jnp.mean(jnp.maximum(ap1 - an1 + margin, 0.0))
    assert jnp.allclose(loss1, ref1, rtol=1e-5, atol=1e-6), (loss1, ref1)

    # Case 2: 2-D distances; tile_rows=16 forces multiple grid steps with a
    # ragged last row-tile, exercising the per-row mask and the pipeline.
    ap2 = jax.random.uniform(k3, (60, 256), dtype=jnp.float32) * 2.0
    an2 = jax.random.uniform(k4, (60, 256), dtype=jnp.float32) * 2.0
    loss2 = triplet_margin_loss(ap2, an2, margin, tile_rows=16)
    jax.block_until_ready(loss2)
    ref2 = jnp.mean(jnp.maximum(ap2 - an2 + margin, 0.0))
    assert jnp.allclose(loss2, ref2, rtol=1e-5, atol=1e-6), (loss2, ref2)

    print("KERNEL_OK")
</pallas_src>

<mosaic_0001>
module attributes {stable_mosaic.version = 11 : i64} {
  func.func @_triplet_hinge_sum_kernel(%arg0: i32, %arg1: memref<1xf32, #tpu.memory_space<smem>>, %arg2: memref<7x128xf32, #tpu.memory_space<vmem>>, %arg3: memref<7x128xf32, #tpu.memory_space<vmem>>, %arg4: memref<1x8x128xf32, #tpu.memory_space<vmem>>) attributes {dimension_semantics = [#tpu.dimension_semantics<parallel>], iteration_bounds = array<i64: 1>, scalar_prefetch = 1 : i64, scratch_operands = 0 : i64, tpu.core_type = #tpu.core_type<tc>, window_params = [{transform_indices = @transform_0, window_bounds = array<i64: 7, 128>}, {transform_indices = @transform_1, window_bounds = array<i64: 7, 128>}, {transform_indices = @transform_2, window_bounds = array<i64: 1, 8, 128>}]} {
    %c0 = arith.constant 0 : index
    %c0_0 = arith.constant 0 : index
    %0 = vector.load %arg2[%c0, %c0_0] : memref<7x128xf32, #tpu.memory_space<vmem>>, vector<7x128xf32>
    %c0_1 = arith.constant 0 : index
    %c0_2 = arith.constant 0 : index
    %1 = vector.load %arg3[%c0_1, %c0_2] : memref<7x128xf32, #tpu.memory_space<vmem>>, vector<7x128xf32>
    %c0_3 = arith.constant 0 : index
    %2 = memref.load %arg1[%c0_3] : memref<1xf32, #tpu.memory_space<smem>>
    %3 = arith.subf %0, %1 : vector<7x128xf32>
    %4 = vector.broadcast %2 : f32 to vector<7x128xf32>
    %5 = arith.addf %3, %4 : vector<7x128xf32>
    %cst = arith.constant 0.000000e+00 : f32
    %6 = vector.broadcast %cst : f32 to vector<7x128xf32>
    %7 = arith.maximumf %5, %6 : vector<7x128xf32>
    %cst_4 = arith.constant dense<0.000000e+00> : vector<7xf32>
    %8 = vector.multi_reduction <add>, %7, %cst_4 [1] : vector<7x128xf32> to vector<7xf32>
    %9 = vector.shape_cast %8 : vector<7xf32> to vector<7x1xf32>
    %10 = vector.shape_cast %9 : vector<7x1xf32> to vector<1x7x1xf32>
    %cst_5 = arith.constant dense<0.000000e+00> : vector<1xf32>
    %11 = vector.multi_reduction <add>, %10, %cst_5 [1, 2] : vector<1x7x1xf32> to vector<1xf32>
    %12 = vector.shape_cast %11 : vector<1xf32> to vector<1x1x1xf32>
    %13 = vector.extract %12[0, 0, 0] : f32 from vector<1x1x1xf32>
    %14 = vector.broadcast %13 : f32 to vector<1x8x128xf32>
    %c0_6 = arith.constant 0 : index
    %c0_7 = arith.constant 0 : index
    %c0_8 = arith.constant 0 : index
    %15 = vector.load %arg4[%c0_6, %c0_7, %c0_8] : memref<1x8x128xf32, #tpu.memory_space<vmem>>, vector<1x8x128xf32>
    tpu.vector_store %arg4[%c0_6, %c0_7, %c0_8], %14 {strides = array<i32>} : memref<1x8x128xf32, #tpu.memory_space<vmem>>, vector<1x8x128xf32>,
    return
  }
  func.func @transform_0(%arg0: i32, %arg1: memref<1xf32, #tpu.memory_space<smem>>) -> (i32, i32) {
    %c0_i32 = arith.constant 0 : i32
    %c0_i32_0 = arith.constant 0 : i32
    return %arg0, %c0_i32 : i32, i32
  }
  func.func @transform_1(%arg0: i32, %arg1: memref<1xf32, #tpu.memory_space<smem>>) -> (i32, i32) {
    %c0_i32 = arith.constant 0 : i32
    %c0_i32_0 = arith.constant 0 : i32
    return %arg0, %c0_i32 : i32, i32
  }
  func.func @transform_2(%arg0: i32, %arg1: memref<1xf32, #tpu.memory_space<smem>>) -> (i32, i32, i32) {
    %c0_i32 = arith.constant 0 : i32
    %c0_i32_0 = arith.constant 0 : i32
    %c0_i32_1 = arith.constant 0 : i32
    return %arg0, %c0_i32, %c0_i32_0 : i32, i32, i32
  }
}

</mosaic_0001>

<bundles_post_ra>
// kernel: tpu_custom_call.1
= control target key start
LH: loop header
LB: loop body
LE: loop exit
PB: predicated region body
PF: predicated region fallthrough
CT: control target
= control target key end

     0   :  { %9 = vsyncpa [#allocation5], 0  ;;  %s184_s0 = inlined_call_operand.<no memory space> [shape: f32[1], index: 0, kind: input, shape index: {}]   ;;  %s185_s1 = inlined_call_operand.hbm [shape: f32[7,128], index: 1, kind: input, shape index: {}]   ;;  %s186_s2 = inlined_call_operand.hbm [shape: f32[7,128], index: 2, kind: input, shape index: {}]   ;;  %s187_s3 = inlined_call_operand.hbm [shape: f32[1,8,128], index: 3, kind: output, shape index: {}]  }
   0x1   :  { %10 = vsyncpa [#allocation8], 0 }
   0x2   :  { %11 = vsyncpa [#allocation6], 0  ;;  %s149_s12 = smov [#allocation4]   ;;  %s150_s14 = smov [#allocation7]  }
   0x3   :  { %s18_s13 = sshll.u32 %s149_s12, 4  ;;  %s28_s15 = sshll.u32 %s150_s14, 4  ;;  %s19_s13 = int_to_ptr.vmem [resolvable:$true] %s18_s13  ;;  %s29_s15 = int_to_ptr.vmem [resolvable:$true] %s28_s15 }
   0x4   :  { %s91_s16 = scalar_lea.vmem %s19_s13, 128  ;;  %p96_p1 = scmp.lt.s32.totalorder %s19_s13, %s19_s13 }
   0x5   :  { %p92_p0 = scmp.ne.s32.totalorder %s19_s13, %s91_s16  ;;  %p97_p2 = scmp.lt.s32.totalorder %s91_s16, %s91_s16 }
   0x7   :  { %p98_p3 = por %p97_p2, %p96_p1 }
   0x9   :  { %p99_p4 = pnand %p98_p3, %p92_p0 }
   0xb   :  { %102 = shalt.err (!%p99_p4)
}
   0xc   :  { %21 = dma.hbm_to_vmem [thread:$0]  %s185_s1, 128, %s19_s13, [#allocation5]  }
   0xd   :  { %s111_s19 = scalar_lea.vmem %s29_s15, 128  ;;  %p116_p6 = scmp.lt.s32.totalorder %s29_s15, %s29_s15 }
   0xe   :  { %p112_p5 = scmp.ne.s32.totalorder %s29_s15, %s111_s19  ;;  %p117_p7 = scmp.lt.s32.totalorder %s111_s19, %s111_s19 }
  0x10   :  { %p118_p8 = por %p117_p7, %p116_p6 }
  0x12   :  { %p119_p9 = pnand %p118_p8, %p112_p5 }
  0x14   :  { %122 = shalt.err (!%p119_p9)
}
  0x15   :  { %31 = dma.hbm_to_vmem [thread:$0]  %s186_s2, 128, %s29_s15, [#allocation8]  }
  0x16   :  { %143 = dma.done.wait [#allocation5], 128  }
  0x17   :  { %144 = vsyncadd [#allocation5], 4294967168 }
  0x18   :  { %145 = dma.done.wait [#allocation8], 128  }
  0x19   :  { %146 = vsyncadd [#allocation8], 4294967168  ;;  %v38_v0 = vld [vmem:[#allocation4] sm:$0x7f]  ;;  %v39_v1 = vld [vmem:[#allocation7] sm:$0x7f]  ;;  %v42_v2 = vstv %s184_s0 }
  0x1a   :  { %v41_v3 = vsub.f32 %v38_v0, %v39_v1  ;;  %vm45_vm0 = vcmask 1046528   ;;  %vm49_vm1 = vcmask 6144   ;;  %s151_s1 = smov [#allocation9]  }
  0x1b   :  { %s68_s0 = sshll.u32 %s151_s1, 4  ;;  %s69_s0 = int_to_ptr.vmem [resolvable:$true] %s68_s0 }
  0x1c   :  { %v43_v4 = vadd.f32 %v42_v2, %v41_v3  ;;  %s123_s24 = scalar_lea.vmem %s69_s0, 128  ;;  %p128_p11 = scmp.lt.s32.totalorder %s69_s0, %s69_s0 }
  0x1d   :  { %p124_p10 = scmp.ne.s32.totalorder %s69_s0, %s123_s24  ;;  %p129_p12 = scmp.lt.s32.totalorder %s123_s24, %s123_s24 }
  0x1e   :  { %v44_v5 = vmax.f32 %v43_v4, 0.0 }
  0x1f   :  { %p130_p13 = por %p129_p12, %p128_p11 }
  0x20   :  { %v46_v6 = vsel %vm45_vm0, %v44_v5, 0.0 }
  0x21   :  { %47 = vadd.xlane.f32.xlu0 %v46_v6  ;;  %p131_p0 = pnand %p130_p13, %p124_p10 }
  0xaa   :  { %v48_v7 = vpop.xlane.xlu0 %47 }
  0xab   :  { %v50_v8 = vsel %vm49_vm1, %v48_v7, 0.0 }
  0xac   :  { %51 = vadd.xlane.f32.xlu0 %v50_v8 }
 0x135   :  { %v52_v9 = vpop.xlane.xlu0 %51 }
 0x136   :  { %v53_v10 = vrot.slane %v52_v9, 4 }
 0x138   :  { %v54_v11 = vadd.f32 %v53_v10, %v52_v9 }
 0x13a   :  { %v55_v12 = vrot.slane %v54_v11, 2 }
 0x13c   :  { %v56_v13 = vadd.f32 %v55_v12, %v54_v11 }
 0x13e   :  { %v57_v14 = vrot.slane %v56_v13, 1 }
 0x140   :  { %v58_v15 = vadd.f32 %v57_v14, %v56_v13 }
 0x142   :  { %78 = vpush %v58_v15 }
 0x173   :  { %s79_s2 = spop %78 }
 0x174   :  { %v60_v16 = vstv %s79_s2 }
 0x175   :  { %61 = vst [vmem:[#allocation9] sm:$0xff] %v60_v16 }
 0x176   :  { %134 = shalt.err (!%p131_p0)
}
 0x177   :  { %71 = dma.vmem_to_hbm [thread:$0]  %s69_s0, 128, %s187_s3, [#allocation6]  }
 0x178   :  { %147 = dma.done.wait [#allocation6], 128  }
 0x179   :  { %148 = vsyncadd [#allocation6], 4294967168 }
 0x17a   :  { %75 = vsyncpa [#allocation5], 1 }
 0x17b   :  { %76 = vsyncpa [#allocation8], 1 }
 0x17c   :  { %77 = vsyncpa [#allocation6], 1 }

</bundles_post_ra>
